<compile_context>
chip_gen: v7x
topology: tpu7x:2x2x1
jax: 0.10.0
libtpu: 0.0.40
codegen_flags: <defaults>
</compile_context>

<pallas_src>
import numpy as np
import jax
import jax.numpy as jnp
from jax.experimental import pallas as pl
from jax.experimental.pallas import tpu as pltpu

NEG_LOGIT = -1e9          # class-padding logit (exp underflows to exactly 0)
LANE_TILE_MAX = 512       # focal lane tile (>=512 reaches ~85% of HBM roofline)
COX_ROW_TILE = 256        # Cox row tile; 2*TM*N*4B stays well under v7x 64 MiB VMEM


def _round_up(x, m):
    return (x + m - 1) // m * m


# ----------------------------- rampup schedule (host-side scalar glue) ---------------

def sigmoid_rampup(current, rampup_length):
    if rampup_length == 0:
        return 1.0
    current = np.clip(current, 0.0, rampup_length)
    phase = 1.0 - current / rampup_length
    return float(np.exp(-5.0 * phase * phase))


def get_current_consistency_weight(epoch, consistency=1.0, consistency_rampup=40):
    return consistency * sigmoid_rampup(epoch, consistency_rampup)


# ----------------------------- fused multi-segment focal loss ------------------------

def _make_focal_kernel(nseg, block_bounds):
    """Kernel over a lane-concatenated [C, TOTAL] logit slab.

    Grid axis walks lane tiles; segment k owns blocks [block_bounds[k], block_bounds[k+1]).
    acc_refs = (sum_0, cnt_0, sum_1, cnt_1, ...), each a (1, 1) f32 VMEM scratch.
    """

    def kernel(logits_ref, labels_ref, out_ref, *acc_refs):
        i = pl.program_id(0)

        @pl.when(i == 0)
        def _init():
            for r in acc_refs:
                r[...] = jnp.zeros_like(r)

        x = logits_ref[...].astype(jnp.float32)                      # [C, TN] (lane-dense)
        lab = labels_ref[...]                                        # [1, TN] int32
        c = x.shape[0]

        # numerically stable log-softmax over the (sublane) class axis
        m = jnp.max(x, axis=0, keepdims=True)                        # [1, TN]
        lse = jnp.log(jnp.sum(jnp.exp(x - m), axis=0, keepdims=True)) + m
        cls = jax.lax.broadcasted_iota(jnp.int32, x.shape, 0)        # class id per sublane
        onehot = (cls == lab).astype(jnp.float32)                    # all-zero where lab == -1
        logpt = jnp.sum((x - lse) * onehot, axis=0, keepdims=True)   # [1, TN]
        pt = jnp.exp(logpt)
        u = 1.0 - pt
        valid = jnp.logical_and(lab >= 0, lab < c).astype(jnp.float32)
        per = (u * u) * logpt * valid                                # gamma=2 -> square, no pow
        s_blk = -jnp.sum(per, axis=1, keepdims=True)                 # (1, 1) masked focal sum
        c_blk = jnp.sum(valid, axis=1, keepdims=True)                # (1, 1) valid count

        for k in range(nseg):
            lo, hi = block_bounds[k], block_bounds[k + 1]

            @pl.when(jnp.logical_and(i >= lo, i < hi))
            def _acc(k=k):
                acc_refs[2 * k][...] += s_blk
                acc_refs[2 * k + 1][...] += c_blk

        @pl.when(i == pl.num_programs(0) - 1)
        def _fin():
            for k in range(nseg):
                s = jnp.sum(acc_refs[2 * k][...])
                cnt = jnp.sum(acc_refs[2 * k + 1][...])
                # mean over valid rows; empty segment -> 0 (torch would NaN on empty gather)
                out_ref[0, k] = s / jnp.maximum(cnt, 1.0)

    return kernel


def multi_focal_loss(segments):
    """Mean focal loss (gamma=2) per (logits[n,c], labels[n]) segment, one pallas_call.

    == [FocalLoss()(lg[lb != -1], lb[lb != -1]) for lg, lb in segments]
    """
    nseg = len(segments)
    c_max = max(int(lg.shape[-1]) for lg, _ in segments)
    dtype = jnp.result_type(*[lg.dtype for lg, _ in segments])
    max_n = max(int(lg.shape[0]) for lg, _ in segments)
    tile = min(LANE_TILE_MAX, _round_up(max(max_n, 1), 128))

    lg_parts, lb_parts, seg_blocks = [], [], []
    for lg, lb in segments:
        n, c = int(lg.shape[0]), int(lg.shape[-1])
        npad = _round_up(max(n, 1), tile)
        lg_t = jnp.transpose(lg.astype(dtype))                       # [c, n] lane-dense
        lg_t = jnp.pad(lg_t, ((0, c_max - c), (0, npad - n)),
                       constant_values=NEG_LOGIT)
        lb_r = jnp.pad(lb.reshape(-1).astype(jnp.int32), (0, npad - n),
                       constant_values=-1).reshape(1, npad)
        lg_parts.append(lg_t)
        lb_parts.append(lb_r)
        seg_blocks.append(npad // tile)

    logits_cat = jnp.concatenate(lg_parts, axis=1)                   # [c_max, TOTAL] native dtype
    labels_cat = jnp.concatenate(lb_parts, axis=1)                   # [1, TOTAL]
    total = logits_cat.shape[1]
    nblk = total // tile
    bounds = [0]
    for b in seg_blocks:
        bounds.append(bounds[-1] + b)

    kernel = _make_focal_kernel(nseg, tuple(bounds))
    out = pl.pallas_call(
        kernel,
        out_shape=jax.ShapeDtypeStruct((1, nseg), jnp.float32),
        grid=(nblk,),
        in_specs=[
            pl.BlockSpec((c_max, tile), lambda i: (0, i)),
            pl.BlockSpec((1, tile), lambda i: (0, i)),
        ],
        out_specs=pl.BlockSpec((1, nseg), lambda i: (0, 0),
                               memory_space=pltpu.MemorySpace.SMEM),
        scratch_shapes=[pltpu.VMEM((1, 1), jnp.float32) for _ in range(2 * nseg)],
        # reduction across the lane-tile axis via shared scratch -> "arbitrary"
        compiler_params=pltpu.CompilerParams(dimension_semantics=("arbitrary",)),
    )(logits_cat, labels_cat)
    return out[0]                                                    # [nseg] per-segment means


# ----------------------------- DeepSurv (Cox partial likelihood) kernel --------------

def _cox_kernel(pred_t_ref, pred_c_ref, t_row_ref, t_col_ref, e_col_ref,
                out_ref, expr_ref, sum_scr, ev_scr):
    i = pl.program_id(0)

    @pl.when(i == 0)
    def _init():
        # P_risk = softmax(pred, axis=1)[:, 0] == sigmoid(x0 - x1) (2 classes), fused here.
        pt_ = pred_t_ref[...].astype(jnp.float32)                    # [2, Np]
        r_row = 1.0 / (1.0 + jnp.exp(pt_[1:2, :] - pt_[0:1, :]))     # [1, Np]
        expr_ref[...] = jnp.exp(r_row)                               # hoisted exp(risk) row
        sum_scr[...] = jnp.zeros_like(sum_scr)
        ev_scr[...] = jnp.zeros_like(ev_scr)

    pc = pred_c_ref[...].astype(jnp.float32)                         # [TM, 2]
    r_col = 1.0 / (1.0 + jnp.exp(pc[:, 1:2] - pc[:, 0:1]))           # [TM, 1]
    t_col = t_col_ref[...]                                           # [TM, 1]
    e_col = e_col_ref[...]                                           # [TM, 1]
    t_row = t_row_ref[...]                                           # [1, Np]
    expr = expr_ref[...]                                             # [1, Np]

    # denominator: sum_j 1[T_j >= T_i] * exp(r_j); single where -> one [TM, Np] intermediate
    den = jnp.sum(jnp.where(t_row >= t_col, expr, 0.0),
                  axis=-1, keepdims=True)                            # [TM, 1]
    partial = (r_col - jnp.log(den)) * e_col                         # [TM, 1]

    sum_scr[...] += jnp.sum(partial, axis=0, keepdims=True)
    ev_scr[...] += jnp.sum(e_col, axis=0, keepdims=True)

    @pl.when(i == pl.num_programs(0) - 1)
    def _fin():
        s = jnp.sum(sum_scr[...])
        ne = jnp.sum(ev_scr[...])
        # 0/0 -> NaN when there are no events; matches the torch "skip if isnan" branch.
        out_ref[0, 0] = -s / ne


def deep_surv_loss_from_pred(pred, times, events):
    """Negative Cox partial log-likelihood with P_risk = softmax(pred)[:, 0], tiled over rows."""
    n = int(pred.shape[0])
    tm = COX_ROW_TILE if n > COX_ROW_TILE else _round_up(n, 8)
    npad = _round_up(n, tm)
    pad = npad - n

    # Padded rows: event=0 (no numerator term); padded columns: time=-1e30 so they are
    # never "at risk" for any real row (times are >= 0).
    pred_p = jnp.pad(pred, ((0, pad), (0, 0)))                       # [Np, 2] native dtype
    t = jnp.pad(times.astype(jnp.float32), (0, pad), constant_values=-1e30)
    e = jnp.pad(events.astype(jnp.float32), (0, pad), constant_values=0.0)
    pred_t = jnp.transpose(pred_p)                                   # [2, Np]

    out = pl.pallas_call(
        _cox_kernel,
        out_shape=jax.ShapeDtypeStruct((1, 1), jnp.float32),
        grid=(npad // tm,),
        in_specs=[
            pl.BlockSpec((2, npad), lambda i: (0, 0)),               # resident, DMA'd once
            pl.BlockSpec((tm, 2), lambda i: (i, 0)),                 # per-block row slice
            pl.BlockSpec((1, npad), lambda i: (0, 0)),               # resident times row
            pl.BlockSpec((tm, 1), lambda i: (i, 0)),
            pl.BlockSpec((tm, 1), lambda i: (i, 0)),
        ],
        out_specs=pl.BlockSpec((1, 1), lambda i: (0, 0),
                               memory_space=pltpu.MemorySpace.SMEM),
        scratch_shapes=[
            pltpu.VMEM((1, npad), jnp.float32),                      # exp(risk) row (computed once)
            pltpu.VMEM((1, 1), jnp.float32),                         # sum of e_i*(r_i - log den_i)
            pltpu.VMEM((1, 1), jnp.float32),                         # number of events
        ],
        # cross-block accumulation in scratch -> "arbitrary"
        compiler_params=pltpu.CompilerParams(dimension_semantics=("arbitrary",)),
    )(pred_t, pred_p, t.reshape(1, npad), t.reshape(npad, 1), e.reshape(npad, 1))
    return out[0, 0]


# ----------------------------- BLLoss forward -----------------------------------------

def bl_loss(batch, results):
    pred = results['pred']                         # [N, 2]
    label = batch['label']                         # [N] int32, -1 = ignore

    segments = [(pred, label)]
    if int(pred.shape[0]) == 1:
        means = multi_focal_loss(segments)
        return means[0]

    cls_weight = 0.1 * (1.0 - get_current_consistency_weight(
        batch['epoch'], consistency=1.0, consistency_rampup=batch['epochs']))

    weights = [1.0]
    if results.get('mask_bags_pred') is not None:
        bp = results['mask_bags_pred']
        segments.append((bp.reshape(-1, bp.shape[-1]), batch['mask_bags_label'].reshape(-1)))
        weights.append(cls_weight)
    if results.get('mask_words_pred') is not None:
        wp = results['mask_words_pred']
        segments.append((wp.reshape(-1, wp.shape[-1]), batch['mask_words_label'].reshape(-1)))
        weights.append(cls_weight)

    means = multi_focal_loss(segments)             # ONE launch for all focal terms

    loss = means[0]
    loss2 = deep_surv_loss_from_pred(pred, batch['pfs'], batch['pfs_censor'])
    loss = loss + jnp.where(jnp.isnan(loss2), 0.0, loss2)
    for k in range(1, len(segments)):
        loss = loss + weights[k] * means[k]
    return loss


# ----------------------------- pure-JAX reference (for self-check) --------------------

def _focal_ref(logits, labels):
    labels = labels.reshape(-1).astype(jnp.int32)
    lg = logits.reshape(-1, logits.shape[-1]).astype(jnp.float32)
    logp = jax.nn.log_softmax(lg, axis=-1)
    safe = jnp.clip(labels, 0, lg.shape[-1] - 1)
    logpt = jnp.take_along_axis(logp, safe[:, None], axis=-1)[:, 0]
    pt = jnp.exp(logpt)
    per = -((1.0 - pt) ** 2) * logpt
    valid = (labels >= 0).astype(jnp.float32)
    return jnp.sum(per * valid) / jnp.maximum(jnp.sum(valid), 1.0)


def _cox_ref(pred, t, e):
    r = jax.nn.softmax(pred.astype(jnp.float32), axis=1)[:, 0]
    at_risk = (t[None, :] >= t[:, None]).astype(jnp.float32)
    den = jnp.sum(at_risk * jnp.exp(r)[None, :], axis=1)
    return -jnp.sum((r - jnp.log(den)) * e) / jnp.sum(e)


def _bl_loss_ref(batch, results):
    pred = results['pred']
    loss = _focal_ref(pred, batch['label'])
    if pred.shape[0] == 1:
        return loss
    l2 = _cox_ref(pred, batch['pfs'], batch['pfs_censor'])
    loss = loss + jnp.where(jnp.isnan(l2), 0.0, l2)
    w = 0.1 * (1.0 - get_current_consistency_weight(
        batch['epoch'], consistency=1.0, consistency_rampup=batch['epochs']))
    if results.get('mask_bags_pred') is not None:
        bp = results['mask_bags_pred']
        loss = loss + w * _focal_ref(bp.reshape(-1, bp.shape[-1]),
                                     batch['mask_bags_label'].reshape(-1))
    if results.get('mask_words_pred') is not None:
        wp = results['mask_words_pred']
        loss = loss + w * _focal_ref(wp.reshape(-1, wp.shape[-1]),
                                     batch['mask_words_label'].reshape(-1))
    return loss


# ----------------------------- demo ----------------------------------------------------

if __name__ == "__main__":
    key = jax.random.PRNGKey(0)
    N, B, NB, NW = 8, 2, 8, 8   # batch, bags per sample, words per sample

    k = jax.random.split(key, 10)
    pred = jax.random.normal(k[0], (N, 2), dtype=jnp.float32)
    label = jnp.array([0, 1, 1, 0, -1, 1, 0, 1], dtype=jnp.int32)          # one ignored row
    pfs = jax.random.uniform(k[1], (N,), minval=1.0, maxval=36.0, dtype=jnp.float32)
    pfs_censor = jnp.array([1, 0, 1, 1, 0, 1, 0, 1], dtype=jnp.float32)    # events present

    mask_bags_pred = jax.random.normal(k[2], (B, NB, 4), dtype=jnp.float32)
    mask_bags_label = jax.random.randint(k[3], (B, NB), -1, 4).astype(jnp.int32)
    mask_words_pred = jax.random.normal(k[4], (B, NW, 4), dtype=jnp.float32)
    mask_words_label = jax.random.randint(k[5], (B, NW), -1, 4).astype(jnp.int32)

    batch = dict(
        label=label, pfs=pfs, pfs_censor=pfs_censor,
        mask_bags_label=mask_bags_label, mask_words_label=mask_words_label,
        epoch=5, epochs=40,
    )
    results = dict(
        pred=pred,
        mask_bags_pred=mask_bags_pred,
        mask_words_pred=mask_words_pred,
    )

    loss = jax.block_until_ready(bl_loss(batch, results))
    ref = jax.block_until_ready(_bl_loss_ref(batch, results))

    assert jnp.isfinite(loss), f"loss not finite: {loss}"
    np.testing.assert_allclose(np.asarray(loss), np.asarray(ref), rtol=5e-3, atol=5e-3)
    print("KERNEL_OK")
</pallas_src>

<mosaic_0001>
module attributes {stable_mosaic.version = 11 : i64} {
  func.func @kernel(%arg0: i32, %arg1: memref<4x128xf32, #tpu.memory_space<vmem>>, %arg2: memref<1x128xi32, #tpu.memory_space<vmem>>, %arg3: memref<1x3xf32, #tpu.memory_space<smem>>, %arg4: memref<1x1xf32, #tpu.memory_space<vmem>>, %arg5: memref<1x1xf32, #tpu.memory_space<vmem>>, %arg6: memref<1x1xf32, #tpu.memory_space<vmem>>, %arg7: memref<1x1xf32, #tpu.memory_space<vmem>>, %arg8: memref<1x1xf32, #tpu.memory_space<vmem>>, %arg9: memref<1x1xf32, #tpu.memory_space<vmem>>) attributes {dimension_semantics = [#tpu.dimension_semantics<arbitrary>], iteration_bounds = array<i64: 3>, scalar_prefetch = 0 : i64, scratch_operands = 6 : i64, tpu.core_type = #tpu.core_type<tc>, window_params = [{transform_indices = @transform_0, window_bounds = array<i64: 4, 128>}, {transform_indices = @transform_1, window_bounds = array<i64: 1, 128>}, {transform_indices = @transform_2, window_bounds = array<i64: 1, 3>}]} {
    %c0_i32 = arith.constant 0 : i32
    %0 = arith.cmpi eq, %arg0, %c0_i32 : i32
    %1 = arith.extui %0 : i1 to i32
    %c0_i32_0 = arith.constant 0 : i32
    %2 = arith.cmpi ne, %1, %c0_i32_0 : i32
    scf.if %2 {
      %cst_19 = arith.constant 0.000000e+00 : f32
      %61 = vector.broadcast %cst_19 : f32 to vector<1x1xf32>
      %c0_20 = arith.constant 0 : index
      %c0_21 = arith.constant 0 : index
      %62 = vector.load %arg4[%c0_20, %c0_21] : memref<1x1xf32, #tpu.memory_space<vmem>>, vector<1x1xf32>
      tpu.vector_store %arg4[%c0_20, %c0_21], %61 {strides = array<i32>} : memref<1x1xf32, #tpu.memory_space<vmem>>, vector<1x1xf32>,
      %cst_22 = arith.constant 0.000000e+00 : f32
      %63 = vector.broadcast %cst_22 : f32 to vector<1x1xf32>
      %c0_23 = arith.constant 0 : index
      %c0_24 = arith.constant 0 : index
      %64 = vector.load %arg5[%c0_23, %c0_24] : memref<1x1xf32, #tpu.memory_space<vmem>>, vector<1x1xf32>
      tpu.vector_store %arg5[%c0_23, %c0_24], %63 {strides = array<i32>} : memref<1x1xf32, #tpu.memory_space<vmem>>, vector<1x1xf32>,
      %cst_25 = arith.constant 0.000000e+00 : f32
      %65 = vector.broadcast %cst_25 : f32 to vector<1x1xf32>
      %c0_26 = arith.constant 0 : index
      %c0_27 = arith.constant 0 : index
      %66 = vector.load %arg6[%c0_26, %c0_27] : memref<1x1xf32, #tpu.memory_space<vmem>>, vector<1x1xf32>
      tpu.vector_store %arg6[%c0_26, %c0_27], %65 {strides = array<i32>} : memref<1x1xf32, #tpu.memory_space<vmem>>, vector<1x1xf32>,
      %cst_28 = arith.constant 0.000000e+00 : f32
      %67 = vector.broadcast %cst_28 : f32 to vector<1x1xf32>
      %c0_29 = arith.constant 0 : index
      %c0_30 = arith.constant 0 : index
      %68 = vector.load %arg7[%c0_29, %c0_30] : memref<1x1xf32, #tpu.memory_space<vmem>>, vector<1x1xf32>
      tpu.vector_store %arg7[%c0_29, %c0_30], %67 {strides = array<i32>} : memref<1x1xf32, #tpu.memory_space<vmem>>, vector<1x1xf32>,
      %cst_31 = arith.constant 0.000000e+00 : f32
      %69 = vector.broadcast %cst_31 : f32 to vector<1x1xf32>
      %c0_32 = arith.constant 0 : index
      %c0_33 = arith.constant 0 : index
      %70 = vector.load %arg8[%c0_32, %c0_33] : memref<1x1xf32, #tpu.memory_space<vmem>>, vector<1x1xf32>
      tpu.vector_store %arg8[%c0_32, %c0_33], %69 {strides = array<i32>} : memref<1x1xf32, #tpu.memory_space<vmem>>, vector<1x1xf32>,
      %cst_34 = arith.constant 0.000000e+00 : f32
      %71 = vector.broadcast %cst_34 : f32 to vector<1x1xf32>
      %c0_35 = arith.constant 0 : index
      %c0_36 = arith.constant 0 : index
      %72 = vector.load %arg9[%c0_35, %c0_36] : memref<1x1xf32, #tpu.memory_space<vmem>>, vector<1x1xf32>
      tpu.vector_store %arg9[%c0_35, %c0_36], %71 {strides = array<i32>} : memref<1x1xf32, #tpu.memory_space<vmem>>, vector<1x1xf32>,
    } else {
    }
    %c0 = arith.constant 0 : index
    %c0_1 = arith.constant 0 : index
    %3 = vector.load %arg1[%c0, %c0_1] : memref<4x128xf32, #tpu.memory_space<vmem>>, vector<4x128xf32>
    %c0_2 = arith.constant 0 : index
    %c0_3 = arith.constant 0 : index
    %4 = vector.load %arg2[%c0_2, %c0_3] : memref<1x128xi32, #tpu.memory_space<vmem>>, vector<1x128xi32>
    %cst = arith.constant dense<0xFF800000> : vector<128xf32>
    %5 = vector.multi_reduction <maximumf>, %3, %cst [0] : vector<4x128xf32> to vector<128xf32>
    %6 = vector.shape_cast %5 : vector<128xf32> to vector<1x128xf32>
    %7 = vector.broadcast %6 : vector<1x128xf32> to vector<4x128xf32>
    %8 = arith.subf %3, %7 : vector<4x128xf32>
    %9 = math.exp %8 : vector<4x128xf32>
    %cst_4 = arith.constant dense<0.000000e+00> : vector<128xf32>
    %10 = vector.multi_reduction <add>, %9, %cst_4 [0] : vector<4x128xf32> to vector<128xf32>
    %11 = vector.shape_cast %10 : vector<128xf32> to vector<1x128xf32>
    %12 = math.log %11 : vector<1x128xf32>
    %13 = arith.addf %12, %6 : vector<1x128xf32>
    %14 = tpu.iota {dimensions = array<i32: 0>} : vector<4x128xi32>
    %15 = vector.broadcast %4 : vector<1x128xi32> to vector<4x128xi32>
    %16 = arith.cmpi eq, %14, %15 : vector<4x128xi32>
    %17 = arith.extui %16 : vector<4x128xi1> to vector<4x128xi32>
    %18 = arith.sitofp %17 : vector<4x128xi32> to vector<4x128xf32>
    %19 = vector.broadcast %13 : vector<1x128xf32> to vector<4x128xf32>
    %20 = arith.subf %3, %19 : vector<4x128xf32>
    %21 = arith.mulf %20, %18 : vector<4x128xf32>
    %cst_5 = arith.constant dense<0.000000e+00> : vector<128xf32>
    %22 = vector.multi_reduction <add>, %21, %cst_5 [0] : vector<4x128xf32> to vector<128xf32>
    %23 = vector.shape_cast %22 : vector<128xf32> to vector<1x128xf32>
    %24 = math.exp %23 : vector<1x128xf32>
    %cst_6 = arith.constant 1.000000e+00 : f32
    %25 = vector.broadcast %cst_6 : f32 to vector<1x128xf32>
    %26 = arith.subf %25, %24 : vector<1x128xf32>
    %c0_i32_7 = arith.constant 0 : i32
    %27 = vector.broadcast %c0_i32_7 : i32 to vector<1x128xi32>
    %28 = arith.cmpi sge, %4, %27 : vector<1x128xi32>
    %c4_i32 = arith.constant 4 : i32
    %29 = vector.broadcast %c4_i32 : i32 to vector<1x128xi32>
    %30 = arith.cmpi slt, %4, %29 : vector<1x128xi32>
    %31 = arith.andi %28, %30 : vector<1x128xi1>
    %32 = arith.extui %31 : vector<1x128xi1> to vector<1x128xi32>
    %33 = arith.sitofp %32 : vector<1x128xi32> to vector<1x128xf32>
    %34 = arith.mulf %26, %26 : vector<1x128xf32>
    %35 = arith.mulf %34, %23 : vector<1x128xf32>
    %36 = arith.mulf %35, %33 : vector<1x128xf32>
    %cst_8 = arith.constant dense<0.000000e+00> : vector<1xf32>
    %37 = vector.multi_reduction <add>, %36, %cst_8 [1] : vector<1x128xf32> to vector<1xf32>
    %38 = vector.shape_cast %37 : vector<1xf32> to vector<1x1xf32>
    %cst_9 = arith.constant 0.000000e+00 : f32
    %39 = vector.broadcast %cst_9 : f32 to vector<1x1xf32>
    %40 = arith.subf %39, %38 : vector<1x1xf32>
    %cst_10 = arith.constant dense<0.000000e+00> : vector<1xf32>
    %41 = vector.multi_reduction <add>, %33, %cst_10 [1] : vector<1x128xf32> to vector<1xf32>
    %42 = vector.shape_cast %41 : vector<1xf32> to vector<1x1xf32>
    %c0_i32_11 = arith.constant 0 : i32
    %43 = arith.cmpi sge, %arg0, %c0_i32_11 : i32
    %c1_i32 = arith.constant 1 : i32
    %44 = arith.cmpi slt, %arg0, %c1_i32 : i32
    %45 = arith.andi %43, %44 : i1
    %46 = arith.extui %45 : i1 to i32
    %c0_i32_12 = arith.constant 0 : i32
    %47 = arith.cmpi ne, %46, %c0_i32_12 : i32
    scf.if %47 {
      %c0_19 = arith.constant 0 : index
      %c0_20 = arith.constant 0 : index
      %61 = vector.load %arg4[%c0_19, %c0_20] : memref<1x1xf32, #tpu.memory_space<vmem>>, vector<1x1xf32>
      %62 = arith.addf %61, %40 : vector<1x1xf32>
      %c0_21 = arith.constant 0 : index
      %c0_22 = arith.constant 0 : index
      %63 = vector.load %arg4[%c0_21, %c0_22] : memref<1x1xf32, #tpu.memory_space<vmem>>, vector<1x1xf32>
      tpu.vector_store %arg4[%c0_21, %c0_22], %62 {strides = array<i32>} : memref<1x1xf32, #tpu.memory_space<vmem>>, vector<1x1xf32>,
      %c0_23 = arith.constant 0 : index
      %c0_24 = arith.constant 0 : index
      %64 = vector.load %arg5[%c0_23, %c0_24] : memref<1x1xf32, #tpu.memory_space<vmem>>, vector<1x1xf32>
      %65 = arith.addf %64, %42 : vector<1x1xf32>
      %c0_25 = arith.constant 0 : index
      %c0_26 = arith.constant 0 : index
      %66 = vector.load %arg5[%c0_25, %c0_26] : memref<1x1xf32, #tpu.memory_space<vmem>>, vector<1x1xf32>
      tpu.vector_store %arg5[%c0_25, %c0_26], %65 {strides = array<i32>} : memref<1x1xf32, #tpu.memory_space<vmem>>, vector<1x1xf32>,
    } else {
    }
    %c1_i32_13 = arith.constant 1 : i32
    %48 = arith.cmpi sge, %arg0, %c1_i32_13 : i32
    %c2_i32 = arith.constant 2 : i32
    %49 = arith.cmpi slt, %arg0, %c2_i32 : i32
    %50 = arith.andi %48, %49 : i1
    %51 = arith.extui %50 : i1 to i32
    %c0_i32_14 = arith.constant 0 : i32
    %52 = arith.cmpi ne, %51, %c0_i32_14 : i32
    scf.if %52 {
      %c0_19 = arith.constant 0 : index
      %c0_20 = arith.constant 0 : index
      %61 = vector.load %arg6[%c0_19, %c0_20] : memref<1x1xf32, #tpu.memory_space<vmem>>, vector<1x1xf32>
      %62 = arith.addf %61, %40 : vector<1x1xf32>
      %c0_21 = arith.constant 0 : index
      %c0_22 = arith.constant 0 : index
      %63 = vector.load %arg6[%c0_21, %c0_22] : memref<1x1xf32, #tpu.memory_space<vmem>>, vector<1x1xf32>
      tpu.vector_store %arg6[%c0_21, %c0_22], %62 {strides = array<i32>} : memref<1x1xf32, #tpu.memory_space<vmem>>, vector<1x1xf32>,
      %c0_23 = arith.constant 0 : index
      %c0_24 = arith.constant 0 : index
      %64 = vector.load %arg7[%c0_23, %c0_24] : memref<1x1xf32, #tpu.memory_space<vmem>>, vector<1x1xf32>
      %65 = arith.addf %64, %42 : vector<1x1xf32>
      %c0_25 = arith.constant 0 : index
      %c0_26 = arith.constant 0 : index
      %66 = vector.load %arg7[%c0_25, %c0_26] : memref<1x1xf32, #tpu.memory_space<vmem>>, vector<1x1xf32>
      tpu.vector_store %arg7[%c0_25, %c0_26], %65 {strides = array<i32>} : memref<1x1xf32, #tpu.memory_space<vmem>>, vector<1x1xf32>,
    } else {
    }
    %c2_i32_15 = arith.constant 2 : i32
    %53 = arith.cmpi sge, %arg0, %c2_i32_15 : i32
    %c3_i32 = arith.constant 3 : i32
    %54 = arith.cmpi slt, %arg0, %c3_i32 : i32
    %55 = arith.andi %53, %54 : i1
    %56 = arith.extui %55 : i1 to i32
    %c0_i32_16 = arith.constant 0 : i32
    %57 = arith.cmpi ne, %56, %c0_i32_16 : i32
    scf.if %57 {
      %c0_19 = arith.constant 0 : index
      %c0_20 = arith.constant 0 : index
      %61 = vector.load %arg8[%c0_19, %c0_20] : memref<1x1xf32, #tpu.memory_space<vmem>>, vector<1x1xf32>
      %62 = arith.addf %61, %40 : vector<1x1xf32>
      %c0_21 = arith.constant 0 : index
      %c0_22 = arith.constant 0 : index
      %63 = vector.load %arg8[%c0_21, %c0_22] : memref<1x1xf32, #tpu.memory_space<vmem>>, vector<1x1xf32>
      tpu.vector_store %arg8[%c0_21, %c0_22], %62 {strides = array<i32>} : memref<1x1xf32, #tpu.memory_space<vmem>>, vector<1x1xf32>,
      %c0_23 = arith.constant 0 : index
      %c0_24 = arith.constant 0 : index
      %64 = vector.load %arg9[%c0_23, %c0_24] : memref<1x1xf32, #tpu.memory_space<vmem>>, vector<1x1xf32>
      %65 = arith.addf %64, %42 : vector<1x1xf32>
      %c0_25 = arith.constant 0 : index
      %c0_26 = arith.constant 0 : index
      %66 = vector.load %arg9[%c0_25, %c0_26] : memref<1x1xf32, #tpu.memory_space<vmem>>, vector<1x1xf32>
      tpu.vector_store %arg9[%c0_25, %c0_26], %65 {strides = array<i32>} : memref<1x1xf32, #tpu.memory_space<vmem>>, vector<1x1xf32>,
    } else {
    }
    %c2_i32_17 = arith.constant 2 : i32
    %58 = arith.cmpi eq, %arg0, %c2_i32_17 : i32
    %59 = arith.extui %58 : i1 to i32
    %c0_i32_18 = arith.constant 0 : i32
    %60 = arith.cmpi ne, %59, %c0_i32_18 : i32
    scf.if %60 {
      %c0_19 = arith.constant 0 : index
      %c0_20 = arith.constant 0 : index
      %61 = vector.load %arg4[%c0_19, %c0_20] : memref<1x1xf32, #tpu.memory_space<vmem>>, vector<1x1xf32>
      %62 = vector.shape_cast %61 : vector<1x1xf32> to vector<1x1x1xf32>
      %cst_21 = arith.constant dense<0.000000e+00> : vector<1xf32>
      %63 = vector.multi_reduction <add>, %62, %cst_21 [1, 2] : vector<1x1x1xf32> to vector<1xf32>
      %64 = vector.shape_cast %63 : vector<1xf32> to vector<1x1x1xf32>
      %65 = vector.extract %64[0, 0, 0] : f32 from vector<1x1x1xf32>
      %c0_22 = arith.constant 0 : index
      %c0_23 = arith.constant 0 : index
      %66 = vector.load %arg5[%c0_22, %c0_23] : memref<1x1xf32, #tpu.memory_space<vmem>>, vector<1x1xf32>
      %67 = vector.shape_cast %66 : vector<1x1xf32> to vector<1x1x1xf32>
      %cst_24 = arith.constant dense<0.000000e+00> : vector<1xf32>
      %68 = vector.multi_reduction <add>, %67, %cst_24 [1, 2] : vector<1x1x1xf32> to vector<1xf32>
      %69 = vector.shape_cast %68 : vector<1xf32> to vector<1x1x1xf32>
      %70 = vector.extract %69[0, 0, 0] : f32 from vector<1x1x1xf32>
      %cst_25 = arith.constant 1.000000e+00 : f32
      %71 = arith.maximumf %70, %cst_25 : f32
      %72 = arith.divf %65, %71 : f32
      %c0_26 = arith.constant 0 : index
      %c0_27 = arith.constant 0 : index
      %73 = memref.load %arg3[%c0_26, %c0_27] : memref<1x3xf32, #tpu.memory_space<smem>>
      memref.store %72, %arg3[%c0_26, %c0_27] : memref<1x3xf32, #tpu.memory_space<smem>>
      %c0_28 = arith.constant 0 : index
      %c0_29 = arith.constant 0 : index
      %74 = vector.load %arg6[%c0_28, %c0_29] : memref<1x1xf32, #tpu.memory_space<vmem>>, vector<1x1xf32>
      %75 = vector.shape_cast %74 : vector<1x1xf32> to vector<1x1x1xf32>
      %cst_30 = arith.constant dense<0.000000e+00> : vector<1xf32>
      %76 = vector.multi_reduction <add>, %75, %cst_30 [1, 2] : vector<1x1x1xf32> to vector<1xf32>
      %77 = vector.shape_cast %76 : vector<1xf32> to vector<1x1x1xf32>
      %78 = vector.extract %77[0, 0, 0] : f32 from vector<1x1x1xf32>
      %c0_31 = arith.constant 0 : index
      %c0_32 = arith.constant 0 : index
      %79 = vector.load %arg7[%c0_31, %c0_32] : memref<1x1xf32, #tpu.memory_space<vmem>>, vector<1x1xf32>
      %80 = vector.shape_cast %79 : vector<1x1xf32> to vector<1x1x1xf32>
      %cst_33 = arith.constant dense<0.000000e+00> : vector<1xf32>
      %81 = vector.multi_reduction <add>, %80, %cst_33 [1, 2] : vector<1x1x1xf32> to vector<1xf32>
      %82 = vector.shape_cast %81 : vector<1xf32> to vector<1x1x1xf32>
      %83 = vector.extract %82[0, 0, 0] : f32 from vector<1x1x1xf32>
      %cst_34 = arith.constant 1.000000e+00 : f32
      %84 = arith.maximumf %83, %cst_34 : f32
      %85 = arith.divf %78, %84 : f32
      %c0_35 = arith.constant 0 : index
      %c1 = arith.constant 1 : index
      %86 = memref.load %arg3[%c0_35, %c1] : memref<1x3xf32, #tpu.memory_space<smem>>
      memref.store %85, %arg3[%c0_35, %c1] : memref<1x3xf32, #tpu.memory_space<smem>>
      %c0_36 = arith.constant 0 : index
      %c0_37 = arith.constant 0 : index
      %87 = vector.load %arg8[%c0_36, %c0_37] : memref<1x1xf32, #tpu.memory_space<vmem>>, vector<1x1xf32>
      %88 = vector.shape_cast %87 : vector<1x1xf32> to vector<1x1x1xf32>
      %cst_38 = arith.constant dense<0.000000e+00> : vector<1xf32>
      %89 = vector.multi_reduction <add>, %88, %cst_38 [1, 2] : vector<1x1x1xf32> to vector<1xf32>
      %90 = vector.shape_cast %89 : vector<1xf32> to vector<1x1x1xf32>
      %91 = vector.extract %90[0, 0, 0] : f32 from vector<1x1x1xf32>
      %c0_39 = arith.constant 0 : index
      %c0_40 = arith.constant 0 : index
      %92 = vector.load %arg9[%c0_39, %c0_40] : memref<1x1xf32, #tpu.memory_space<vmem>>, vector<1x1xf32>
      %93 = vector.shape_cast %92 : vector<1x1xf32> to vector<1x1x1xf32>
      %cst_41 = arith.constant dense<0.000000e+00> : vector<1xf32>
      %94 = vector.multi_reduction <add>, %93, %cst_41 [1, 2] : vector<1x1x1xf32> to vector<1xf32>
      %95 = vector.shape_cast %94 : vector<1xf32> to vector<1x1x1xf32>
      %96 = vector.extract %95[0, 0, 0] : f32 from vector<1x1x1xf32>
      %cst_42 = arith.constant 1.000000e+00 : f32
      %97 = arith.maximumf %96, %cst_42 : f32
      %98 = arith.divf %91, %97 : f32
      %c0_43 = arith.constant 0 : index
      %c2 = arith.constant 2 : index
      %99 = memref.load %arg3[%c0_43, %c2] : memref<1x3xf32, #tpu.memory_space<smem>>
      memref.store %98, %arg3[%c0_43, %c2] : memref<1x3xf32, #tpu.memory_space<smem>>
    } else {
    }
    return
  }
  func.func @transform_0(%arg0: i32) -> (i32, i32) {
    %c0_i32 = arith.constant 0 : i32
    %c0_i32_0 = arith.constant 0 : i32
    return %c0_i32, %arg0 : i32, i32
  }
  func.func @transform_1(%arg0: i32) -> (i32, i32) {
    %c0_i32 = arith.constant 0 : i32
    %c0_i32_0 = arith.constant 0 : i32
    return %c0_i32, %arg0 : i32, i32
  }
  func.func @transform_2(%arg0: i32) -> (i32, i32) {
    %c0_i32 = arith.constant 0 : i32
    %c0_i32_0 = arith.constant 0 : i32
    %c0_i32_1 = arith.constant 0 : i32
    return %c0_i32, %c0_i32_0 : i32, i32
  }
}

</mosaic_0001>

<bundles_post_ra>
// kernel: tpu_custom_call.1
= control target key start
LH: loop header
LB: loop body
LE: loop exit
PB: predicated region body
PF: predicated region fallthrough
CT: control target
= control target key end

     0   :  { %7 = vsyncpa [#allocation9], 0  ;;  %s720_s0 = inlined_call_operand.hbm [shape: f32[4,384], index: 0, kind: input, shape index: {}]   ;;  %s721_s1 = inlined_call_operand.vmem [shape: s32[1,384], index: 1, kind: input, shape index: {}]   ;;  %s722_s2 = inlined_call_operand.hbm [shape: f32[1,3], index: 2, kind: output, shape index: {}]  }
   0x1   :  { %9 = vsyncpa [#allocation9 + $0x1], 0 }
   0x2   :  { %10 = vsyncpa [#allocation10], 0  ;;  %s575_s9 = smov 0   ;;  %s577_s10 = smov 0  }
   0x3   :  { %s579_s11 = smov 0   ;;  %s581_s12 = smov 0  }
   0x4 LB: > { %s594_s13 = sadd.s32 4294967295, %s553_s12   ;;  %s597_s14 = sadd.s32 1, %s553_s12   ;;  %s553_s12 = sphi %s581_s12, %s730_s12   ;;  %s549_s11 = sphi %s579_s11, %s729_s11   ;;  %s545_s10 = sphi %s577_s10, %s728_s10   ;;  %s541_s9 = sphi %s575_s9, %s727_s9  }
   0x5   : > { %s20_s15 = ssub.s32 %s553_s12, %s597_s14  ;;  %s23_s16 = sadd.s32 1, %s549_s11 }
   0x6   : > { %p21_p0 = scmp.eq.s32.totalorder %s20_s15, 0  ;;  %p30_p1 = scmp.ne.s32.totalorder %s549_s11, %s545_s10 }
   0x7   : > { %p31_p2 = scmp.eq.s32.totalorder %s553_s12, 0  ;;  %p36_p3 = scmp.ne.s32.totalorder %s545_s10, %s541_s9 }
   0x8   : > { %s607_s17 = scalar_select %p21_p0, %s549_s11, %s23_s16  }
   0x9   : > { %p32_p4 = por %p31_p2, %p30_p1  ;;  %p37_p5 = scmp.eq.s32.totalorder %s594_s13, 0 }
   0xa   : > { %p422_p6 = scmp.lt.s32.totalorder %s553_s12, 3  ;;  %s107_s19 = sand.u32 1, %s549_s11  }
   0xb   : > { %p611_p7 = por %p37_p5, %p36_p3  ;;  %s382_s20 = sshll.u32 %s107_s19, 2 }
   0xc   : > { %s383_s21 = sshll.u32 %s553_s12, 6  ;;  %s111_s25 = scalar_lea.vmem [#allocation8], %s382_s20 }
   0xd   : > { %s620_s24 = scalar_lea.hbm %s720_s0, %s383_s21  ;;  %s118_s26 = sshll.u32 %s111_s25, 4  ;;  %s622_s26 = int_to_ptr.vmem [resolvable:$true] %s118_s26 }
   0xe   : > { %p624_p8 = pnand %p422_p6, %p32_p4  ;;  %s108_s28 = scalar_lea.sflag [#allocation9], %s107_s19 }
   0xf   : > { %s473_s29 = scalar_lea.hbm %s620_s24, 64  ;;  %s478_s4 = scalar_lea.hbm %s720_s0, 192 }
  0x10   : > { %p474_p11 = scmp.ne.s32.totalorder %s620_s24, %s473_s29  ;;  %p475_p12 = pneg %p624_p8 }
  0x11   : > { %p479_p1 = scmp.lt.u32.totalorder %s620_s24, %s720_s0  ;;  %p480_p2 = scmp.lt.u32.totalorder %s478_s4, %s473_s29 }
  0x12   : > { %p476_p13 = pnand %p475_p12, %p474_p11  ;;  %p482_p4 = scmp.lt.u32.totalorder %s473_s29, %s620_s24 }
  0x13   : > { %p481_p3 = por %p480_p2, %p479_p1 }
  0x14   : > { %p477_p0 = pneg %p476_p13 }
  0x15   : > { %p483_p5 = por %p482_p4, %p481_p3 }
  0x17   : > { %p484_p6 = pnand %p483_p5, %p477_p0 }
  0x19   : > { %487 = shalt.err (!%p484_p6)
}
  0x1a   : > { %s488_s7 = scalar_lea.vmem %s622_s26, 64  ;;  %s555_s8 = smov [#allocation8]  }
  0x1b   : > { %p489_p11 = scmp.ne.s32.totalorder %s622_s26, %s488_s7  ;;  %s493_s9 = sshll.u32 %s555_s8, 4  ;;  %s494_s9 = int_to_ptr.vmem [resolvable:$false] %s493_s9 }
  0x1c   : > { %s495_s15 = scalar_lea.vmem %s494_s9, 128  ;;  %p496_p10 = scmp.lt.s32.totalorder %s622_s26, %s494_s9 }
  0x1d   : > { %p491_p13 = pnand %p489_p11, %p475_p12  ;;  %p497_p1 = scmp.lt.s32.totalorder %s495_s15, %s488_s7 }
  0x1f   : > { %p492_p9 = pneg %p491_p13  ;;  %p498_p2 = por %p497_p1, %p496_p10 }
  0x21   : > { %p499_p3 = pnand %p498_p2, %p492_p9 }
  0x23   : > { %502 = shalt.err (!%p499_p3)
}
  0x24   : > { %421 = dma.hbm_to_vmem [thread:$0]  (!%p624_p8), %s620_s24, 64, %s622_s26, %s108_s28  }
  0x25   : > { %p725_p0 = scmp.lt.s32.totalorder %s553_s12, 4  ;;  %p726_p4 = scmp.ge.s32.totalorder %s553_s12, 1 }
  0x27   : > { %p130_p12 = pnand %p726_p4, %p725_p0 }
  0x28   : > { %s135_s16 = sand.u32 (!%p130_p12), 1, %s545_s10  }
  0x29   : > { %133 = sbr.rel (%p130_p12) target bundleno = 590 (0x24e), region = 28  ;;  %s385_s19 = sshll.u32 (!%p130_p12), %s135_s16, 2 }
  0x2a   : > { %s136_s20 = scalar_lea.sflag (!%p130_p12), [#allocation9], %s135_s16  ;;  %s139_s21 = scalar_lea.vmem (!%p130_p12), [#allocation8], %s385_s19 }
  0x30   : > { %532 = dma.done.wait (%p611_p7), %s136_s20, 64  }
  0x31   : > { %534 = vsyncadd (%p611_p7), %s136_s20, 4294967232  ;;  %p158_p9 = scmp.lt.s32.totalorder %s594_s13, 2  ;;  %p386_p8 = scmp.ne.s32.totalorder %s594_s13, 0 }
  0x32   : > { %vm165_vm0 = vcmask (!%p386_p8), 0   ;;  %v556_v0 = vmov (!%p386_p8), 0.0  }
  0x33   : > { %s668_s22 = scalar_select %p158_p9, %s594_s13, 2 }
  0x34   : > { %164 = sbr.rel (%p386_p8) target bundleno = 59 (0x3b), region = 36  ;;  %166 = vst.msk [vmem:[#allocation2] sm:$0x1] (!%p386_p8), %vm165_vm0, %v556_v0  ;;  %167 = vst.msk [vmem:[#allocation3] sm:$0x1] (!%p386_p8), %vm165_vm0, %v556_v0 }
  0x35   : > { %s160_s24 = scalar_lea.vmem %s721_s1, %s668_s22  ;;  %168 = vst.msk [vmem:[#allocation4] sm:$0x1] (!%p386_p8), %vm165_vm0, %v556_v0  ;;  %169 = vst.msk [vmem:[#allocation5] sm:$0x1] (!%p386_p8), %vm165_vm0, %v556_v0 }
  0x36   : > { %170 = vst.msk [vmem:[#allocation6] sm:$0x1] (!%p386_p8), %vm165_vm0, %v556_v0  ;;  %171 = vst.msk [vmem:[#allocation7] sm:$0x1] (!%p386_p8), %vm165_vm0, %v556_v0 }
  0x3b PF: > { %v172_v1 = vld [vmem:[%s139_s21] sm:$0xf]  ;;  %vm174_vm1 = vcmask 1043456   ;;  %v195_v17 = vlaneseq  ;;  %v173_v22 = vld [vmem:[%s160_s24] sm:$0x1]  ;;  %v557_v27 = vmov 0.0  }
  0x3c   : > { %v175_v2 = vsel %vm174_vm1, %v172_v1, -inf  ;;  %vm216_vm3 = vcmp.ge.s32.totalorder %v173_v22, 0  ;;  %vm217_vm4 = vcmp.lt.s32.totalorder %v173_v22, 4  ;;  %vm224_vm6 = vcmask 1040384   ;;  %p232_p7 = scmp.ge.s32.totalorder %s594_s13, 0  ;;  %p233_p10 = scmp.lt.s32.totalorder %s594_s13, 1 }
  0x3d   : > { %v176_v3 = vrot.slane %v175_v2, 4  ;;  %v196_v20 = vshrl.u32 %v195_v17, 7  ;;  %vm218_vm5 = vmand %vm216_vm3, %vm217_vm4 }
  0x3e   : > { %v388_v42 = vsel %vm218_vm5, 1.0, %v557_v27  ;;  %p234_p5 = pnand %p233_p10, %p232_p7 }
  0x3f   : > { %v177_v4 = vmax.f32 %v175_v2, %v176_v3  ;;  %v199_v21 = vsub.s32 0, %v196_v20  ;;  %v229_v46 = vsel %vm224_vm6, %v388_v42, 0.0  ;;  %v238_v50 = vld [vmem:[#allocation2] sm:$0x1] (!%p234_p5)  ;;  %vm240_vm7 = vcmask (!%p234_p5), 0  }
  0x40   : > { %v242_v51 = vld [vmem:[#allocation3] sm:$0x1] (!%p234_p5) }
  0x41   : > { %v178_v5 = vrot.slane %v177_v4, 2  ;;  %v200_v23 = vrot.slane %v173_v22, %v199_v21 }
  0x43   : > { %v179_v6 = vmax.f32 %v177_v4, %v178_v5  ;;  %vm201_vm2 = vcmp.eq.s32.totalorder %v196_v20, %v200_v23 }
  0x44   : > { %v387_v28 = vsel %vm201_vm2, 1.0, %v557_v27 }
  0x45   : > { %v180_v7 = vrot.slane %v179_v6, 1 }
  0x47   : > { %v181_v8 = vmax.f32 %v179_v6, %v180_v7 }
  0x49   : > { %v182_v9 = vsub.f32 %v172_v1, %v181_v8 }
  0x4b   : > { %v183_v10 = vmul.f32 1.442695, %v182_v9 }
  0x4d   : > { %461 = vpow2.f32 %v183_v10 }
  0x57   : > { %v462_v11 = vpop.eup %461 }
  0x58   : > { %v185_v12 = vsel %vm174_vm1, %v462_v11, 0.0 }
  0x59   : > { %v186_v13 = vrot.slane %v185_v12, 4 }
  0x5b   : > { %v187_v14 = vadd.f32 %v186_v13, %v185_v12 }
  0x5d   : > { %v188_v15 = vrot.slane %v187_v14, 2 }
  0x5f   : > { %v189_v16 = vadd.f32 %v188_v15, %v187_v14 }
  0x61   : > { %v190_v18 = vrot.slane %v189_v16, 1 }
  0x63   : > { %v191_v19 = vadd.f32 %v190_v18, %v189_v16 }
  0x65   : > { %463 = vlog2.f32 %v191_v19 }
  0x6f   : > { %v464_v24 = vpop.eup %463 }
  0x70   : > { %v193_v25 = vmul.f32 0.6931472, %v464_v24 }
  0x72   : > { %v194_v26 = vadd.f32 %v193_v25, %v181_v8 }
  0x74   : > { %v204_v29 = vsub.f32 %v172_v1, %v194_v26 }
  0x76   : > { %v205_v30 = vmul.f32 %v387_v28, %v204_v29 }
  0x78   : > { %v206_v31 = vsel %vm174_vm1, %v205_v30, 0.0 }
  0x79   : > { %v207_v32 = vrot.slane %v206_v31, 4 }
  0x7b   : > { %v208_v33 = vadd.f32 %v207_v32, %v206_v31 }
  0x7d   : > { %v209_v34 = vrot.slane %v208_v33, 2 }
  0x7f   : > { %v210_v35 = vadd.f32 %v209_v34, %v208_v33 }
  0x81   : > { %v211_v36 = vrot.slane %v210_v35, 1 }
  0x83   : > { %v212_v37 = vadd.f32 %v211_v36, %v210_v35 }
  0x85   : > { %v213_v38 = vmul.f32 1.442695, %v212_v37 }
  0x87   : > { %465 = vpow2.f32 %v213_v38 }
  0x91   : > { %v466_v39 = vpop.eup %465 }
  0x92   : > { %v215_v40 = vsub.f32 1.0, %v466_v39 }
  0x94   : > { %v221_v41 = vmul.f32 %v215_v40, %v215_v40 }
  0x96   : > { %v222_v43 = vmul.f32 %v221_v41, %v212_v37 }
  0x98   : > { %v223_v44 = vmul.f32 %v388_v42, %v222_v43 }
  0x9a   : > { %v225_v45 = vsel %vm224_vm6, %v223_v44, 0.0 }
  0x9b   : > { %226 = vadd.xlane.f32.xlu0 %v225_v45 }
  0x9f   : > { %230 = vadd.xlane.f32.xlu0 %v229_v46 }
 0x126   : > { %237 = sbr.rel (%p234_p5) target bundleno = 304 (0x130), region = 40 }
 0x128   : > { %v227_v47 = vpop.xlane.xlu0 %226 }
 0x129   : > { %v228_v48 = vsub.f32 0.0, %v227_v47 }
 0x12b   : > { %v239_v52 = vadd.f32 (!%p234_p5), %v238_v50, %v228_v48 }
 0x12c   : > { %v231_v49 = vpop.xlane.xlu0 %230 }
 0x12d   : > { %v243_v53 = vadd.f32 %v242_v51, %v231_v49  ;;  %241 = vst.msk [vmem:[#allocation2] sm:$0x1] %vm240_vm7, %v239_v52 }
 0x12f   : > { %244 = vst.msk [vmem:[#allocation3] sm:$0x1] %vm240_vm7, %v243_v53 }
 0x130 PF: > { %p245_p6 = scmp.ge.s32.totalorder %s594_s13, 1 }
 0x132   : > { %p247_p11 = pnand %p245_p6, %p158_p9 }
 0x133   : > { %v251_v54 = vld [vmem:[#allocation4] sm:$0x1] (!%p247_p11)  ;;  %vm253_vm8 = vcmask (!%p247_p11), 0   ;;  %v255_v55 = vld [vmem:[#allocation5] sm:$0x1] (!%p247_p11) }
 0x134   : > { %250 = sbr.rel (%p247_p11) target bundleno = 315 (0x13b), region = 44  ;;  %v252_v56 = vadd.f32 (!%p247_p11), %v251_v54, %v228_v48  ;;  %v256_v57 = vadd.f32 (!%p247_p11), %v255_v55, %v231_v49 }
 0x136   : > { %254 = vst.msk [vmem:[#allocation4] sm:$0x1] (!%p247_p11), %vm253_vm8, %v252_v56  ;;  %257 = vst.msk [vmem:[#allocation5] sm:$0x1] (!%p247_p11), %vm253_vm8, %v256_v57 }
 0x13b PF: > { %p258_p13 = scmp.ge.s32.totalorder %s594_s13, 2  ;;  %p259_p1 = scmp.lt.s32.totalorder %s594_s13, 3 }
 0x13d   : > { %p260_p2 = pnand %p259_p1, %p258_p13 }
 0x13e   : > { %v264_v58 = vld [vmem:[#allocation6] sm:$0x1] (!%p260_p2)  ;;  %vm266_vm9 = vcmask (!%p260_p2), 0   ;;  %v268_v59 = vld [vmem:[#allocation7] sm:$0x1] (!%p260_p2) }
 0x13f   : > { %263 = sbr.rel (%p260_p2) target bundleno = 326 (0x146), region = 48  ;;  %v265_v60 = vadd.f32 (!%p260_p2), %v264_v58, %v228_v48  ;;  %v269_v61 = vadd.f32 (!%p260_p2), %v268_v59, %v231_v49 }
 0x141   : > { %267 = vst.msk [vmem:[#allocation6] sm:$0x1] (!%p260_p2), %vm266_vm9, %v265_v60  ;;  %270 = vst.msk [vmem:[#allocation7] sm:$0x1] (!%p260_p2), %vm266_vm9, %v269_v61 }
 0x146 PF: > { %p389_p3 = scmp.ne.s32.totalorder %s594_s13, 2 }
 0x147   : > { %v275_v62 = vld [vmem:[#allocation2] sm:$0x1] (!%p389_p3)  ;;  %v278_v63 = vld [vmem:[#allocation3] sm:$0x1] (!%p389_p3)  ;;  %s558_s28 = smov (!%p389_p3), 1.0  }
 0x148   : > { %274 = sbr.rel (%p389_p3) target bundleno = 575 (0x23f), region = 52  ;;  %394 = vpush (!%p389_p3), %v275_v62  ;;  %v288_v1 = vld [vmem:[#allocation4] sm:$0x1] (!%p389_p3)  ;;  %v291_v3 = vld [vmem:[#allocation5] sm:$0x1] (!%p389_p3) }
 0x149   : > { %396 = vpush (!%p389_p3), %v278_v63  ;;  %v301_v5 = vld [vmem:[#allocation6] sm:$0x1] (!%p389_p3)  ;;  %v304_v7 = vld [vmem:[#allocation7] sm:$0x1] (!%p389_p3) }
 0x179   : > { %s395_s26 = spop %394 }
 0x17a   : > { %s397_s27 = spop %396 }
 0x17b   : > { %s281_s29 = smax.f32 %s558_s28, %s397_s27 }
 0x17c   : > { %v282_v0 = vstv %s281_s29 }
 0x17d   : > { %467 = vrcp.f32 %v282_v0 }
 0x187   : > { %v468_v2 = vpop.eup %467 }
 0x188   : > { %398 = vpush %v468_v2 }
 0x189   : > { %400 = vpush %v288_v1 }
 0x18a   : > { %402 = vpush %v291_v3 }
 0x1b9   : > { %s399_s30 = spop %398 }
 0x1ba   : > { %s285_s3 = smul.f32 %s399_s30, %s395_s26  ;;  %s401_s4 = spop %400 }
 0x1bb   : > { %s403_s5 = spop %402 }
 0x1bc   : > { %287 = sst [smem:[#allocation11]] %s285_s3  ;;  %s294_s6 = smax.f32 %s558_s28, %s403_s5 }
 0x1bd   : > { %v295_v4 = vstv %s294_s6 }
 0x1be   : > { %469 = vrcp.f32 %v295_v4 }
 0x1c8   : > { %v470_v6 = vpop.eup %469 }
 0x1c9   : > { %404 = vpush %v470_v6 }
 0x1ca   : > { %406 = vpush %v301_v5 }
 0x1cb   : > { %408 = vpush %v304_v7 }
 0x1fa   : > { %s405_s7 = spop %404 }
 0x1fb   : > { %s298_s8 = smul.f32 %s405_s7, %s401_s4  ;;  %s407_s9 = spop %406 }
 0x1fc   : > { %s409_s15 = spop %408 }
 0x1fd   : > { %300 = sst [smem:[#allocation11 + $0x1]] %s298_s8  ;;  %s307_s16 = smax.f32 %s558_s28, %s409_s15 }
 0x1fe   : > { %v308_v8 = vstv %s307_s16 }
 0x1ff   : > { %471 = vrcp.f32 %v308_v8 }
 0x209   : > { %v472_v9 = vpop.eup %471 }
 0x20a   : > { %410 = vpush %v472_v9 }
 0x23b   : > { %s411_s19 = spop %410 }
 0x23c   : > { %s311_s20 = smul.f32 %s411_s19, %s407_s9 }
 0x23e   : > { %313 = sst [smem:[#allocation11 + $0x2]] %s311_s20 }
 0x23f PF: > { %p423_p0 = scmp.eq.s32.totalorder %s594_s13, 2  ;;  %s503_s12 = scalar_lea.hbm %s722_s2, 16 }
 0x240   : > { %p504_p4 = scmp.ne.s32.totalorder %s722_s2, %s503_s12  ;;  %p509_p8 = scmp.lt.u32.totalorder %s503_s12, %s722_s2 }
 0x242   : > { %p505_p12 = pnand %p504_p4, %p423_p0 }
 0x244   : > { %p506_p9 = pneg %p505_p12 }
 0x246   : > { %p511_p7 = pnand %p509_p8, %p506_p9 }
 0x248   : > { %514 = shalt.err (!%p511_p7)
}
 0x249   : > { %s559_s26 = smov [#allocation11]  }
 0x24a   : > { %415 = dma.smem_to_hbm (%p423_p0), %s559_s26, 16, %s722_s2, [#allocation10]  }
 0x24b   : > { %536 = dma.done.wait (%p423_p0), [#allocation10], 16  }
 0x24c   : > { %538 = vsyncadd (%p423_p0), [#allocation10], 4294967280 }
 0x24d   : > { %327 = sfence }
 0x24e PF: > { %p13_p10 = scmp.ge.s32.totalorder %s597_s14, 5   ;;  %s727_s9 = smov %s545_s10 }
 0x24f   : > { %s728_s10 = smov %s549_s11  ;;  %s729_s11 = smov %s607_s17 }
 0x250   : > { %s730_s12 = smov %s597_s14  ;;  %15 = sbr.rel (!%p13_p10) target bundleno = 4 (0x4), region = 91 }
 0x257   :  { %333 = vsyncpa [#allocation9], 1 }
 0x258   :  { %335 = vsyncpa [#allocation9 + $0x1], 1 }
 0x259   :  { %336 = vsyncpa [#allocation10], 1 }
 0x25a   :  { %338 = vsyncpa [#allocation10 + $0x1], 1 }

</bundles_post_ra>
